<compile_context>
chip_gen: v7x
topology: tpu7x:2x2x1
jax: 0.10.0
libtpu: 0.0.40
codegen_flags: <defaults>
</compile_context>

<pallas_src>
import functools

import jax
import jax.numpy as jnp
from jax.experimental import pallas as pl
from jax.experimental.pallas import tpu as pltpu


def _round_up(x, m):
    return (x + m - 1) // m * m


def _decoder_kernel(x_ref, h0_ref, w_rz_ref, b_rz_ref, w_in_ref, b_in_ref,
                    w_hn_ref, b_hn_ref, w_out_ref, b_out_ref,
                    logp_ref, h_out_ref, *, n_layers, hp):
    """One decode timestep per grid iteration.

    x_ref:    (1, Bp, Op)   padded f_input for this timestep
    h0_ref:   (Bp, Hp)      initial hidden (read only at t == 0)
    w_rz_ref: (Op+Hp, 2Hp)  fused [W_ir;W_hr | W_iz;W_hz]^T (padded, zeros elsewhere)
    b_rz_ref: (1, 2Hp)      b_ir+b_hr | b_iz+b_hz
    w_in_ref: (Op, Hp)      W_in^T ; b_in_ref: (1, Hp)
    w_hn_ref: (Hp, Hp)      W_hn^T ; b_hn_ref: (1, Hp)
    w_out_ref:(Hp, Op)      Linear weight^T ; b_out_ref: (1, Op) (-1e30 on pad lanes)
    logp_ref: (1, Bp, Op)   per-step log-softmax output
    h_out_ref:(Bp, Hp)      resident hidden-state carry / final hidden
    """
    t = pl.program_id(0)

    # Seed the resident hidden block from the initial hidden state.
    @pl.when(t == 0)
    def _():
        h_out_ref[...] = h0_ref[...]

    h = h_out_ref[...]
    out = x_ref[0]

    # Hoist weight/bias loads out of the unrolled layer loop (no CSE of
    # broadcast_in_dim otherwise).
    w_rz = w_rz_ref[...]
    b_rz = b_rz_ref[...]
    w_in = w_in_ref[...]
    b_in = b_in_ref[...]
    w_hn = w_hn_ref[...]
    b_hn = b_hn_ref[...]

    # The PyTorch module re-applies the SAME single-layer GRU n_layers times.
    for _ in range(n_layers):
        x = jnp.maximum(out, 0.0)                       # F.relu
        xh = jnp.concatenate([x, h], axis=-1)           # (Bp, Op+Hp)
        # Fused r/z gates: one MXU op covers both input and hidden matmuls.
        rz = jnp.dot(xh, w_rz, preferred_element_type=jnp.float32) + b_rz
        r = jax.nn.sigmoid(rz[:, :hp])                  # lane-tile-aligned slice
        z = jax.nn.sigmoid(rz[:, hp:])
        i_n = jnp.dot(x, w_in, preferred_element_type=jnp.float32) + b_in
        h_n = jnp.dot(h, w_hn, preferred_element_type=jnp.float32) + b_hn
        n = jnp.tanh(i_n + r * h_n)
        h = (1.0 - z) * n + z * h                       # new hidden
        out = h                                         # GRU output (seq_len=1)

    h_out_ref[...] = h

    # Linear + LogSoftmax(dim=1).  Padded logit lanes carry a -1e30 bias so
    # they vanish from the softmax sum; padded batch rows are sliced away in
    # the wrapper.
    logits = jnp.dot(h, w_out_ref[...],
                     preferred_element_type=jnp.float32) + b_out_ref[...]
    m = jnp.max(logits, axis=-1, keepdims=True)
    shifted = logits - m
    lse = jnp.log(jnp.sum(jnp.exp(shifted), axis=-1, keepdims=True))
    logp_ref[0] = shifted - lse


def _prepare_kernel_params(params, H, O, Hp, Op):
    """Split/transpose/pad the PyTorch-layout GRU + Linear weights."""
    w_ih = params["w_ih"].astype(jnp.float32)   # (3H, O)  gate order: r, z, n
    w_hh = params["w_hh"].astype(jnp.float32)   # (3H, H)
    b_ih = params["b_ih"].astype(jnp.float32)   # (3H,)
    b_hh = params["b_hh"].astype(jnp.float32)   # (3H,)

    wih_r, wih_z, wih_n = w_ih[:H], w_ih[H:2 * H], w_ih[2 * H:]
    whh_r, whh_z, whh_n = w_hh[:H], w_hh[H:2 * H], w_hh[2 * H:]
    bih_r, bih_z, bih_n = b_ih[:H], b_ih[H:2 * H], b_ih[2 * H:]
    bhh_r, bhh_z, bhh_n = b_hh[:H], b_hh[H:2 * H], b_hh[2 * H:]

    # Fused r/z weight: x-part occupies rows [0:O], h-part rows [Op:Op+H];
    # r-gate occupies lanes [0:H], z-gate lanes [Hp:Hp+H].  Padding is zero so
    # padded input/hidden lanes contribute nothing.
    w_rz = jnp.zeros((Op + Hp, 2 * Hp), jnp.float32)
    w_rz = w_rz.at[:O, :H].set(wih_r.T)
    w_rz = w_rz.at[:O, Hp:Hp + H].set(wih_z.T)
    w_rz = w_rz.at[Op:Op + H, :H].set(whh_r.T)
    w_rz = w_rz.at[Op:Op + H, Hp:Hp + H].set(whh_z.T)

    b_rz = jnp.zeros((1, 2 * Hp), jnp.float32)
    b_rz = b_rz.at[0, :H].set(bih_r + bhh_r)
    b_rz = b_rz.at[0, Hp:Hp + H].set(bih_z + bhh_z)

    w_in = jnp.zeros((Op, Hp), jnp.float32).at[:O, :H].set(wih_n.T)
    b_in = jnp.zeros((1, Hp), jnp.float32).at[0, :H].set(bih_n)
    w_hn = jnp.zeros((Hp, Hp), jnp.float32).at[:H, :H].set(whh_n.T)
    b_hn = jnp.zeros((1, Hp), jnp.float32).at[0, :H].set(bhh_n)

    w_out = jnp.zeros((Hp, Op), jnp.float32).at[:H, :O].set(
        params["w_out"].astype(jnp.float32).T)
    b_out = jnp.full((1, Op), -1e30, jnp.float32).at[0, :O].set(
        params["b_out"].astype(jnp.float32))
    return w_rz, b_rz, w_in, b_in, w_hn, b_hn, w_out, b_out


@functools.partial(jax.jit, static_argnames=("n_layers",))
def _run_decoder(x_steps, hidden, params, *, n_layers):
    """x_steps: (T, B, O); hidden: (1, B, H).

    Returns (log_probs (T, B, O), hidden (1, B, H)).  Each grid step applies
    one full DecoderRNN.forward; weights stay resident in VMEM across steps.
    """
    T, B, O = x_steps.shape
    H = hidden.shape[-1]
    if n_layers > 1 and O != H:
        # Mirrors the PyTorch module's own constraint (GRU input dim == O).
        raise ValueError("n_layers > 1 requires output_size == hidden_size")

    Bp = _round_up(max(B, 8), 8)     # sublane-dense batch
    Hp = _round_up(H, 128)           # lane-dense hidden
    Op = _round_up(O, 128)           # lane-dense output / vocab

    x_pad = jnp.zeros((T, Bp, Op), jnp.float32)
    x_pad = x_pad.at[:, :B, :O].set(x_steps.astype(jnp.float32))
    h_pad = jnp.zeros((Bp, Hp), jnp.float32)
    h_pad = h_pad.at[:B, :H].set(hidden.reshape(B, H).astype(jnp.float32))

    kparams = _prepare_kernel_params(params, H, O, Hp, Op)
    kernel = functools.partial(_decoder_kernel, n_layers=n_layers, hp=Hp)

    step_map = lambda t: (t, 0, 0)   # per-timestep blocks
    const2 = lambda t: (0, 0)        # resident (weights / hidden) blocks

    logp_pad, h_out = pl.pallas_call(
        kernel,
        grid=(T,),
        in_specs=[
            pl.BlockSpec((1, Bp, Op), step_map),          # x
            pl.BlockSpec((Bp, Hp), const2),               # h0
            pl.BlockSpec((Op + Hp, 2 * Hp), const2),      # w_rz
            pl.BlockSpec((1, 2 * Hp), const2),            # b_rz
            pl.BlockSpec((Op, Hp), const2),               # w_in
            pl.BlockSpec((1, Hp), const2),                # b_in
            pl.BlockSpec((Hp, Hp), const2),               # w_hn
            pl.BlockSpec((1, Hp), const2),                # b_hn
            pl.BlockSpec((Hp, Op), const2),               # w_out
            pl.BlockSpec((1, Op), const2),                # b_out
        ],
        out_specs=(
            pl.BlockSpec((1, Bp, Op), step_map),          # log-probs per step
            pl.BlockSpec((Bp, Hp), const2),               # final hidden (carry)
        ),
        out_shape=(
            jax.ShapeDtypeStruct((T, Bp, Op), jnp.float32),
            jax.ShapeDtypeStruct((Bp, Hp), jnp.float32),
        ),
        input_output_aliases={1: 1},                      # hidden in -> hidden out
        compiler_params=pltpu.CompilerParams(
            dimension_semantics=("arbitrary",)),          # hidden carried across T
    )(x_pad, h_pad, *kparams)

    return logp_pad[:, :B, :O], h_out[:B, :H].reshape(1, B, H)


def decoder_rnn_forward(f_input, hidden, params, *, n_layers=1):
    """Single-step forward, exact DecoderRNN.forward semantics."""
    logp, h_new = _run_decoder(f_input[None], hidden, params, n_layers=n_layers)
    return logp[0], h_new


def decoder_rnn_forward_steps(f_inputs, hidden, params, *, n_layers=1):
    """Fused multi-timestep decode: applies forward() sequentially over
    f_inputs[t] in a single pallas_call (weights DMA'd once)."""
    return _run_decoder(f_inputs, hidden, params, n_layers=n_layers)


def init_params(key, hidden_size, output_size):
    """Deterministic parameter init mirroring nn.GRU / nn.Linear shapes."""
    ks = jax.random.split(key, 6)
    bound = 1.0 / jnp.sqrt(hidden_size)
    u = lambda k, shape: jax.random.uniform(k, shape, jnp.float32, -bound, bound)
    return {
        "w_ih": u(ks[0], (3 * hidden_size, output_size)),   # GRU weight_ih_l0
        "w_hh": u(ks[1], (3 * hidden_size, hidden_size)),   # GRU weight_hh_l0
        "b_ih": u(ks[2], (3 * hidden_size,)),
        "b_hh": u(ks[3], (3 * hidden_size,)),
        "w_out": u(ks[4], (output_size, hidden_size)),      # Linear weight
        "b_out": u(ks[5], (output_size,)),
    }


# -------------------- pure-JAX reference (PyTorch math) --------------------

def _reference_forward(f_input, hidden, params, n_layers):
    H = hidden.shape[-1]
    h = hidden[0]
    out = f_input
    for _ in range(n_layers):
        x = jnp.maximum(out, 0.0)
        gi = x @ params["w_ih"].T + params["b_ih"]
        gh = h @ params["w_hh"].T + params["b_hh"]
        i_r, i_z, i_n = gi[:, :H], gi[:, H:2 * H], gi[:, 2 * H:]
        h_r, h_z, h_n = gh[:, :H], gh[:, H:2 * H], gh[:, 2 * H:]
        r = jax.nn.sigmoid(i_r + h_r)
        z = jax.nn.sigmoid(i_z + h_z)
        n = jnp.tanh(i_n + r * h_n)
        h = (1.0 - z) * n + z * h
        out = h
    logits = h @ params["w_out"].T + params["b_out"]
    return jax.nn.log_softmax(logits, axis=-1), h[None]


def _reference_steps(f_inputs, hidden, params, n_layers):
    logps = []
    h = hidden
    for t in range(f_inputs.shape[0]):
        lp, h = _reference_forward(f_inputs[t], h, params, n_layers)
        logps.append(lp)
    return jnp.stack(logps), h


if __name__ == "__main__":
    batch = 2
    hidden_size = 32
    output_size = 16
    n_layers = 1

    key = jax.random.PRNGKey(0)
    k_in, k_h, k_p, k_seq = jax.random.split(key, 4)

    f_input = jax.random.normal(k_in, (batch, output_size), jnp.float32)
    hidden = jax.random.normal(k_h, (1, batch, hidden_size), jnp.float32)
    params = init_params(k_p, hidden_size, output_size)

    # Single-step forward (matches DecoderRNN.forward exactly).
    log_probs, new_hidden = decoder_rnn_forward(
        f_input, hidden, params, n_layers=n_layers)
    jax.block_until_ready((log_probs, new_hidden))

    assert log_probs.shape == (batch, output_size)
    assert new_hidden.shape == (1, batch, hidden_size)
    ref_lp, ref_h = _reference_forward(f_input, hidden, params, n_layers)
    assert jnp.allclose(log_probs, ref_lp, atol=1e-4, rtol=1e-4)
    assert jnp.allclose(new_hidden, ref_h, atol=1e-4, rtol=1e-4)
    assert jnp.allclose(jnp.sum(jnp.exp(log_probs), axis=-1), 1.0, atol=1e-4)

    # Fused multi-timestep decode: one pallas_call, weights resident over T.
    T = 4
    f_steps = jax.random.normal(k_seq, (T, batch, output_size), jnp.float32)
    lps, h_T = decoder_rnn_forward_steps(f_steps, hidden, params,
                                         n_layers=n_layers)
    jax.block_until_ready((lps, h_T))
    ref_lps, ref_hT = _reference_steps(f_steps, hidden, params, n_layers)
    assert jnp.allclose(lps, ref_lps, atol=1e-4, rtol=1e-4)
    assert jnp.allclose(h_T, ref_hT, atol=1e-4, rtol=1e-4)

    print("KERNEL_OK")
</pallas_src>

<mosaic_0001>
module attributes {stable_mosaic.version = 11 : i64} {
  func.func @_decoder_kernel(%arg0: i32, %arg1: memref<1x8x128xf32, #tpu.memory_space<vmem>>, %arg2: memref<8x128xf32, #tpu.memory_space<vmem>>, %arg3: memref<256x256xf32, #tpu.memory_space<vmem>>, %arg4: memref<1x256xf32, #tpu.memory_space<vmem>>, %arg5: memref<128x128xf32, #tpu.memory_space<vmem>>, %arg6: memref<1x128xf32, #tpu.memory_space<vmem>>, %arg7: memref<128x128xf32, #tpu.memory_space<vmem>>, %arg8: memref<1x128xf32, #tpu.memory_space<vmem>>, %arg9: memref<128x128xf32, #tpu.memory_space<vmem>>, %arg10: memref<1x128xf32, #tpu.memory_space<vmem>>, %arg11: memref<1x8x128xf32, #tpu.memory_space<vmem>>, %arg12: memref<8x128xf32, #tpu.memory_space<vmem>>) attributes {dimension_semantics = [#tpu.dimension_semantics<arbitrary>], iteration_bounds = array<i64: 1>, scalar_prefetch = 0 : i64, scratch_operands = 0 : i64, tpu.core_type = #tpu.core_type<tc>, window_params = [{transform_indices = @transform_0, window_bounds = array<i64: 1, 8, 128>}, {pipeline_mode = #tpu.pipeline_mode<synchronous>, transform_indices = @transform_1, window_bounds = array<i64: 8, 128>}, {pipeline_mode = #tpu.pipeline_mode<synchronous>, transform_indices = @transform_2, window_bounds = array<i64: 256, 256>}, {pipeline_mode = #tpu.pipeline_mode<synchronous>, transform_indices = @transform_3, window_bounds = array<i64: 1, 256>}, {pipeline_mode = #tpu.pipeline_mode<synchronous>, transform_indices = @transform_4, window_bounds = array<i64: 128, 128>}, {pipeline_mode = #tpu.pipeline_mode<synchronous>, transform_indices = @transform_5, window_bounds = array<i64: 1, 128>}, {pipeline_mode = #tpu.pipeline_mode<synchronous>, transform_indices = @transform_6, window_bounds = array<i64: 128, 128>}, {pipeline_mode = #tpu.pipeline_mode<synchronous>, transform_indices = @transform_7, window_bounds = array<i64: 1, 128>}, {pipeline_mode = #tpu.pipeline_mode<synchronous>, transform_indices = @transform_8, window_bounds = array<i64: 128, 128>}, {pipeline_mode = #tpu.pipeline_mode<synchronous>, transform_indices = @transform_9, window_bounds = array<i64: 1, 128>}, {transform_indices = @transform_10, window_bounds = array<i64: 1, 8, 128>}, {pipeline_mode = #tpu.pipeline_mode<synchronous>, transform_indices = @transform_11, window_bounds = array<i64: 8, 128>}]} {
    %c0_i32 = arith.constant 0 : i32
    %0 = arith.cmpi eq, %arg0, %c0_i32 : i32
    %1 = arith.extui %0 : i1 to i32
    %c0_i32_0 = arith.constant 0 : i32
    %2 = arith.cmpi ne, %1, %c0_i32_0 : i32
    scf.if %2 {
      %c0_35 = arith.constant 0 : index
      %c0_36 = arith.constant 0 : index
      %63 = vector.load %arg2[%c0_35, %c0_36] : memref<8x128xf32, #tpu.memory_space<vmem>>, vector<8x128xf32>
      %c0_37 = arith.constant 0 : index
      %c0_38 = arith.constant 0 : index
      %64 = vector.load %arg12[%c0_37, %c0_38] : memref<8x128xf32, #tpu.memory_space<vmem>>, vector<8x128xf32>
      tpu.vector_store %arg12[%c0_37, %c0_38], %63 {strides = array<i32>} : memref<8x128xf32, #tpu.memory_space<vmem>>, vector<8x128xf32>,
    } else {
    }
    %c0 = arith.constant 0 : index
    %c0_1 = arith.constant 0 : index
    %3 = vector.load %arg12[%c0, %c0_1] : memref<8x128xf32, #tpu.memory_space<vmem>>, vector<8x128xf32>
    %c0_2 = arith.constant 0 : index
    %c0_3 = arith.constant 0 : index
    %c0_4 = arith.constant 0 : index
    %4 = vector.load %arg1[%c0_2, %c0_3, %c0_4] : memref<1x8x128xf32, #tpu.memory_space<vmem>>, vector<1x8x128xf32>
    %5 = vector.shape_cast %4 : vector<1x8x128xf32> to vector<8x128xf32>
    %c0_5 = arith.constant 0 : index
    %c0_6 = arith.constant 0 : index
    %6 = vector.load %arg3[%c0_5, %c0_6] : memref<256x256xf32, #tpu.memory_space<vmem>>, vector<256x256xf32>
    %c0_7 = arith.constant 0 : index
    %c0_8 = arith.constant 0 : index
    %7 = vector.load %arg4[%c0_7, %c0_8] : memref<1x256xf32, #tpu.memory_space<vmem>>, vector<1x256xf32>
    %c0_9 = arith.constant 0 : index
    %c0_10 = arith.constant 0 : index
    %8 = vector.load %arg5[%c0_9, %c0_10] : memref<128x128xf32, #tpu.memory_space<vmem>>, vector<128x128xf32>
    %c0_11 = arith.constant 0 : index
    %c0_12 = arith.constant 0 : index
    %9 = vector.load %arg6[%c0_11, %c0_12] : memref<1x128xf32, #tpu.memory_space<vmem>>, vector<1x128xf32>
    %c0_13 = arith.constant 0 : index
    %c0_14 = arith.constant 0 : index
    %10 = vector.load %arg7[%c0_13, %c0_14] : memref<128x128xf32, #tpu.memory_space<vmem>>, vector<128x128xf32>
    %c0_15 = arith.constant 0 : index
    %c0_16 = arith.constant 0 : index
    %11 = vector.load %arg8[%c0_15, %c0_16] : memref<1x128xf32, #tpu.memory_space<vmem>>, vector<1x128xf32>
    %cst = arith.constant 0.000000e+00 : f32
    %12 = vector.broadcast %cst : f32 to vector<8x128xf32>
    %13 = arith.maximumf %5, %12 : vector<8x128xf32>
    %14 = tpu.concatenate %13, %3 in 1 : vector<8x128xf32>, vector<8x128xf32> -> vector<8x256xf32>
    %cst_17 = arith.constant dense<0.000000e+00> : vector<8x256xf32>
    %15 = tpu.matmul %14, %6, %cst_17 {dimension_numbers = #tpu.dot_dimension_numbers<[1], [0], [0], [1], [0, 0, 1, 1], [], []>} : vector<8x256xf32>, vector<256x256xf32>, vector<8x256xf32> -> vector<8x256xf32>
    %16 = vector.broadcast %7 : vector<1x256xf32> to vector<8x256xf32>
    %17 = arith.addf %15, %16 : vector<8x256xf32>
    %18 = vector.extract_strided_slice %17 {offsets = [0, 0], sizes = [8, 128], strides = [1, 1]} : vector<8x256xf32> to vector<8x128xf32>
    %19 = arith.negf %18 : vector<8x128xf32>
    %20 = math.exp %19 : vector<8x128xf32>
    %cst_18 = arith.constant 1.000000e+00 : f32
    %21 = vector.broadcast %cst_18 : f32 to vector<8x128xf32>
    %22 = arith.addf %21, %20 : vector<8x128xf32>
    %23 = arith.divf %21, %22 : vector<8x128xf32>
    %24 = vector.extract_strided_slice %17 {offsets = [0, 128], sizes = [8, 128], strides = [1, 1]} : vector<8x256xf32> to vector<8x128xf32>
    %25 = arith.negf %24 : vector<8x128xf32>
    %26 = math.exp %25 : vector<8x128xf32>
    %cst_19 = arith.constant 1.000000e+00 : f32
    %27 = vector.broadcast %cst_19 : f32 to vector<8x128xf32>
    %28 = arith.addf %27, %26 : vector<8x128xf32>
    %29 = arith.divf %27, %28 : vector<8x128xf32>
    %cst_20 = arith.constant dense<0.000000e+00> : vector<8x128xf32>
    %30 = tpu.matmul %13, %8, %cst_20 {dimension_numbers = #tpu.dot_dimension_numbers<[1], [0], [0], [1], [0, 0, 1, 1], [], []>} : vector<8x128xf32>, vector<128x128xf32>, vector<8x128xf32> -> vector<8x128xf32>
    %31 = vector.broadcast %9 : vector<1x128xf32> to vector<8x128xf32>
    %32 = arith.addf %30, %31 : vector<8x128xf32>
    %cst_21 = arith.constant dense<0.000000e+00> : vector<8x128xf32>
    %33 = tpu.matmul %3, %10, %cst_21 {dimension_numbers = #tpu.dot_dimension_numbers<[1], [0], [0], [1], [0, 0, 1, 1], [], []>} : vector<8x128xf32>, vector<128x128xf32>, vector<8x128xf32> -> vector<8x128xf32>
    %34 = vector.broadcast %11 : vector<1x128xf32> to vector<8x128xf32>
    %35 = arith.addf %33, %34 : vector<8x128xf32>
    %36 = arith.mulf %23, %35 : vector<8x128xf32>
    %37 = arith.addf %32, %36 : vector<8x128xf32>
    %38 = math.tanh %37 : vector<8x128xf32>
    %cst_22 = arith.constant 1.000000e+00 : f32
    %39 = vector.broadcast %cst_22 : f32 to vector<8x128xf32>
    %40 = arith.subf %39, %29 : vector<8x128xf32>
    %41 = arith.mulf %40, %38 : vector<8x128xf32>
    %42 = arith.mulf %29, %3 : vector<8x128xf32>
    %43 = arith.addf %41, %42 : vector<8x128xf32>
    %c0_23 = arith.constant 0 : index
    %c0_24 = arith.constant 0 : index
    %44 = vector.load %arg12[%c0_23, %c0_24] : memref<8x128xf32, #tpu.memory_space<vmem>>, vector<8x128xf32>
    tpu.vector_store %arg12[%c0_23, %c0_24], %43 {strides = array<i32>} : memref<8x128xf32, #tpu.memory_space<vmem>>, vector<8x128xf32>,
    %c0_25 = arith.constant 0 : index
    %c0_26 = arith.constant 0 : index
    %45 = vector.load %arg9[%c0_25, %c0_26] : memref<128x128xf32, #tpu.memory_space<vmem>>, vector<128x128xf32>
    %cst_27 = arith.constant dense<0.000000e+00> : vector<8x128xf32>
    %46 = tpu.matmul %43, %45, %cst_27 {dimension_numbers = #tpu.dot_dimension_numbers<[1], [0], [0], [1], [0, 0, 1, 1], [], []>} : vector<8x128xf32>, vector<128x128xf32>, vector<8x128xf32> -> vector<8x128xf32>
    %c0_28 = arith.constant 0 : index
    %c0_29 = arith.constant 0 : index
    %47 = vector.load %arg10[%c0_28, %c0_29] : memref<1x128xf32, #tpu.memory_space<vmem>>, vector<1x128xf32>
    %48 = vector.broadcast %47 : vector<1x128xf32> to vector<8x128xf32>
    %49 = arith.addf %46, %48 : vector<8x128xf32>
    %cst_30 = arith.constant dense<0xFF800000> : vector<8xf32>
    %50 = vector.multi_reduction <maximumf>, %49, %cst_30 [1] : vector<8x128xf32> to vector<8xf32>
    %51 = vector.shape_cast %50 : vector<8xf32> to vector<8x1xf32>
    %52 = vector.broadcast %51 : vector<8x1xf32> to vector<8x128xf32>
    %53 = arith.subf %49, %52 : vector<8x128xf32>
    %54 = math.exp %53 : vector<8x128xf32>
    %cst_31 = arith.constant dense<0.000000e+00> : vector<8xf32>
    %55 = vector.multi_reduction <add>, %54, %cst_31 [1] : vector<8x128xf32> to vector<8xf32>
    %56 = vector.shape_cast %55 : vector<8xf32> to vector<8x1xf32>
    %57 = math.log %56 : vector<8x1xf32>
    %58 = vector.broadcast %57 : vector<8x1xf32> to vector<8x128xf32>
    %59 = arith.subf %53, %58 : vector<8x128xf32>
    %c0_32 = arith.constant 0 : index
    %c0_33 = arith.constant 0 : index
    %c0_34 = arith.constant 0 : index
    %60 = vector.load %arg11[%c0_32, %c0_33, %c0_34] : memref<1x8x128xf32, #tpu.memory_space<vmem>>, vector<1x8x128xf32>
    %61 = vector.shape_cast %60 : vector<1x8x128xf32> to vector<8x128xf32>
    %62 = vector.shape_cast %59 : vector<8x128xf32> to vector<1x8x128xf32>
    tpu.vector_store %arg11[%c0_32, %c0_33, %c0_34], %62 {strides = array<i32>} : memref<1x8x128xf32, #tpu.memory_space<vmem>>, vector<1x8x128xf32>,
    return
  }
  func.func @transform_0(%arg0: i32) -> (i32, i32, i32) {
    %c0_i32 = arith.constant 0 : i32
    %c0_i32_0 = arith.constant 0 : i32
    %c0_i32_1 = arith.constant 0 : i32
    return %arg0, %c0_i32, %c0_i32_0 : i32, i32, i32
  }
  func.func @transform_1(%arg0: i32) -> (i32, i32) {
    %c0_i32 = arith.constant 0 : i32
    %c0_i32_0 = arith.constant 0 : i32
    %c0_i32_1 = arith.constant 0 : i32
    return %c0_i32, %c0_i32_0 : i32, i32
  }
  func.func @transform_2(%arg0: i32) -> (i32, i32) {
    %c0_i32 = arith.constant 0 : i32
    %c0_i32_0 = arith.constant 0 : i32
    %c0_i32_1 = arith.constant 0 : i32
    return %c0_i32, %c0_i32_0 : i32, i32
  }
  func.func @transform_3(%arg0: i32) -> (i32, i32) {
    %c0_i32 = arith.constant 0 : i32
    %c0_i32_0 = arith.constant 0 : i32
    %c0_i32_1 = arith.constant 0 : i32
    return %c0_i32, %c0_i32_0 : i32, i32
  }
  func.func @transform_4(%arg0: i32) -> (i32, i32) {
    %c0_i32 = arith.constant 0 : i32
    %c0_i32_0 = arith.constant 0 : i32
    %c0_i32_1 = arith.constant 0 : i32
    return %c0_i32, %c0_i32_0 : i32, i32
  }
  func.func @transform_5(%arg0: i32) -> (i32, i32) {
    %c0_i32 = arith.constant 0 : i32
    %c0_i32_0 = arith.constant 0 : i32
    %c0_i32_1 = arith.constant 0 : i32
    return %c0_i32, %c0_i32_0 : i32, i32
  }
  func.func @transform_6(%arg0: i32) -> (i32, i32) {
    %c0_i32 = arith.constant 0 : i32
    %c0_i32_0 = arith.constant 0 : i32
    %c0_i32_1 = arith.constant 0 : i32
    return %c0_i32, %c0_i32_0 : i32, i32
  }
  func.func @transform_7(%arg0: i32) -> (i32, i32) {
    %c0_i32 = arith.constant 0 : i32
    %c0_i32_0 = arith.constant 0 : i32
    %c0_i32_1 = arith.constant 0 : i32
    return %c0_i32, %c0_i32_0 : i32, i32
  }
  func.func @transform_8(%arg0: i32) -> (i32, i32) {
    %c0_i32 = arith.constant 0 : i32
    %c0_i32_0 = arith.constant 0 : i32
    %c0_i32_1 = arith.constant 0 : i32
    return %c0_i32, %c0_i32_0 : i32, i32
  }
  func.func @transform_9(%arg0: i32) -> (i32, i32) {
    %c0_i32 = arith.constant 0 : i32
    %c0_i32_0 = arith.constant 0 : i32
    %c0_i32_1 = arith.constant 0 : i32
    return %c0_i32, %c0_i32_0 : i32, i32
  }
  func.func @transform_10(%arg0: i32) -> (i32, i32, i32) {
    %c0_i32 = arith.constant 0 : i32
    %c0_i32_0 = arith.constant 0 : i32
    %c0_i32_1 = arith.constant 0 : i32
    return %arg0, %c0_i32, %c0_i32_0 : i32, i32, i32
  }
  func.func @transform_11(%arg0: i32) -> (i32, i32) {
    %c0_i32 = arith.constant 0 : i32
    %c0_i32_0 = arith.constant 0 : i32
    %c0_i32_1 = arith.constant 0 : i32
    return %c0_i32, %c0_i32_0 : i32, i32
  }
}

</mosaic_0001>

<bundles_post_ra>
// kernel: _run_decoder.1
= control target key start
LH: loop header
LB: loop body
LE: loop exit
PB: predicated region body
PF: predicated region fallthrough
CT: control target
= control target key end

     0   :  { %v825_v3 = vmov 0.0|0.0   ;;  %vm826_vm0 = vmmov 0   ;;  %v827_v4 = vmov 0.0   ;;  %s1290_s2 = inlined_call_operand.vmem [shape: f32[256,256], index: 2, kind: input, shape index: {}]   ;;  %s1291_s4 = inlined_call_operand.vmem [shape: f32[128,128], index: 4, kind: input, shape index: {}]   ;;  %s1292_s1 = inlined_call_operand.vmem [shape: f32[8,128], index: 1, kind: input, shape index: {}, may-alias: {1,11}]   ;;  %s1293_s0 = inlined_call_operand.vmem [shape: f32[1,8,128], index: 0, kind: input, shape index: {}]   ;;  %s1294_s6 = inlined_call_operand.vmem [shape: f32[128,128], index: 6, kind: input, shape index: {}]   ;;  %s1295_s8 = inlined_call_operand.vmem [shape: f32[128,128], index: 8, kind: input, shape index: {}]   ;;  %s1296_s3 = inlined_call_operand.vmem [shape: f32[1,256], index: 3, kind: input, shape index: {}]   ;;  %s1297_s7 = inlined_call_operand.vmem [shape: f32[1,128], index: 7, kind: input, shape index: {}]   ;;  %s1298_s5 = inlined_call_operand.vmem [shape: f32[1,128], index: 5, kind: input, shape index: {}]   ;;  %s1299_s11 = inlined_call_operand.vmem [shape: f32[8,128], index: 11, kind: output, shape index: {1}, may-alias: {1,11}]   ;;  %s1300_s9 = inlined_call_operand.vmem [shape: f32[1,128], index: 9, kind: input, shape index: {}]   ;;  %s1301_s10 = inlined_call_operand.vmem [shape: f32[1,8,128], index: 10, kind: output, shape index: {0}]  }
   0x1   :  { %v46_v0 = vld [vmem:[%s1290_s2 + $0x8] sm:$0xff]  ;;  %v48_v1 = vld [vmem:[%s1290_s2 + $0x18] sm:$0xff]  ;;  %v45_v2 = vld [vmem:[%s1290_s2] sm:$0xff]  ;;  %736 = vmatprep.subr.bf16.mxu1 %v825_v3  ;;  %599 = vmatprep.mubr.msk.f32.mxu1 %vm826_vm0, %v827_v4 }
   0x2   :  { %v672_v5 = vpack.c.bf16 %v48_v1, %v46_v0  ;;  %v47_v6 = vld [vmem:[%s1290_s2 + $0x10] sm:$0xff]  ;;  %v50_v7 = vld [vmem:[%s1290_s2 + $0x28] sm:$0xff]  ;;  %v52_v8 = vld [vmem:[%s1290_s2 + $0x38] sm:$0xff] }
   0x3   :  { %v674_v9 = vpack.c.bf16 %v47_v6, %v45_v2  ;;  %v676_v10 = vpack.c.bf16 %v52_v8, %v50_v7  ;;  %v49_v11 = vld [vmem:[%s1290_s2 + $0x20] sm:$0xff]  ;;  %v51_v12 = vld [vmem:[%s1290_s2 + $0x30] sm:$0xff]  ;;  %v54_v13 = vld [vmem:[%s1290_s2 + $0x48] sm:$0xff] }
   0x4   :  { %673 = vmatprep.subr.bf16.mxu0 %v672_v5  ;;  %v56_v14 = vld [vmem:[%s1290_s2 + $0x58] sm:$0xff]  ;;  %v678_v15 = vpack.c.bf16 %v51_v12, %v49_v11  ;;  %v53_v17 = vld [vmem:[%s1290_s2 + $0x40] sm:$0xff]  ;;  %v55_v18 = vld [vmem:[%s1290_s2 + $0x50] sm:$0xff] }
   0x5   :  { %675 = vmatpush1.bf16.msra.mxu0 %v674_v9  ;;  %v680_v16 = vpack.c.bf16 %v56_v14, %v54_v13  ;;  %v58_v19 = vld [vmem:[%s1290_s2 + $0x68] sm:$0xff]  ;;  %v60_v20 = vld [vmem:[%s1290_s2 + $0x78] sm:$0xff]  ;;  %v682_v21 = vpack.c.bf16 %v55_v18, %v53_v17  ;;  %v57_v22 = vld [vmem:[%s1290_s2 + $0x60] sm:$0xff] }
   0x6   :  { %677 = vmatprep.subr.bf16.mxu0 %v676_v10  ;;  %v684_v23 = vpack.c.bf16 %v60_v20, %v58_v19  ;;  %v59_v24 = vld [vmem:[%s1290_s2 + $0x70] sm:$0xff]  ;;  %v110_v25 = vld [vmem:[%s1291_s4] sm:$0xff]  ;;  %v111_v26 = vld [vmem:[%s1291_s4 + $0x8] sm:$0xff] }
   0x7   :  { %v62_v27 = vld [vmem:[%s1290_s2 + $0x88] sm:$0xff]  ;;  %v64_v28 = vld [vmem:[%s1290_s2 + $0x98] sm:$0xff]  ;;  %v737_v29 = vpack.c.bf16 %v111_v26, %v110_v25  ;;  %v112_v30 = vld [vmem:[%s1291_s4 + $0x10] sm:$0xff]  ;;  %v686_v32 = vpack.c.bf16 %v59_v24, %v57_v22 }
   0x8   :  { %v113_v31 = vld [vmem:[%s1291_s4 + $0x18] sm:$0xff]  ;;  %v61_v33 = vld [vmem:[%s1290_s2 + $0x80] sm:$0xff]  ;;  %v688_v35 = vpack.c.bf16 %v64_v28, %v62_v27  ;;  %v63_v36 = vld [vmem:[%s1290_s2 + $0x90] sm:$0xff] }
   0x9   :  { %679 = vmatpush1.bf16.msra.mxu0 %v678_v15  ;;  %738 = vmatpush3.bf16.msra.mxu1 %v737_v29  ;;  %v740_v34 = vpack.c.bf16 %v113_v31, %v112_v30  ;;  %v114_v37 = vld [vmem:[%s1291_s4 + $0x20] sm:$0xff]  ;;  %v115_v38 = vld [vmem:[%s1291_s4 + $0x28] sm:$0xff]  ;;  %v68_v40 = vld [vmem:[%s1290_s2 + $0xb8] sm:$0xff]  ;;  %v690_v41 = vpack.c.bf16 %v63_v36, %v61_v33 }
   0xa   :  { %681 = vmatprep.subr.bf16.mxu0 %v680_v16  ;;  %739 = vmatprep.subr.bf16.mxu1 %v825_v3  ;;  %v66_v39 = vld [vmem:[%s1290_s2 + $0xa8] sm:$0xff]  ;;  %v65_v42 = vld [vmem:[%s1290_s2 + $0xa0] sm:$0xff]  ;;  %v743_v43 = vpack.c.bf16 %v115_v38, %v114_v37  ;;  %v67_v45 = vld [vmem:[%s1290_s2 + $0xb0] sm:$0xff] }
   0xb   :  { %v692_v44 = vpack.c.bf16 %v68_v40, %v66_v39  ;;  %v116_v46 = vld [vmem:[%s1291_s4 + $0x30] sm:$0xff]  ;;  %v117_v47 = vld [vmem:[%s1291_s4 + $0x38] sm:$0xff]  ;;  %v70_v48 = vld [vmem:[%s1290_s2 + $0xc8] sm:$0xff]  ;;  %v694_v50 = vpack.c.bf16 %v67_v45, %v65_v42 }
   0xc   :  { %v72_v49 = vld [vmem:[%s1290_s2 + $0xd8] sm:$0xff]  ;;  %v69_v51 = vld [vmem:[%s1290_s2 + $0xc0] sm:$0xff]  ;;  %v746_v52 = vpack.c.bf16 %v117_v47, %v116_v46  ;;  %v71_v54 = vld [vmem:[%s1290_s2 + $0xd0] sm:$0xff] }
   0xd   :  { %683 = vmatpush1.bf16.msra.mxu0 %v682_v21  ;;  %741 = vmatpush3.bf16.msra.mxu1 %v740_v34  ;;  %v696_v53 = vpack.c.bf16 %v72_v49, %v70_v48  ;;  %v118_v55 = vld [vmem:[%s1291_s4 + $0x40] sm:$0xff]  ;;  %v119_v56 = vld [vmem:[%s1291_s4 + $0x48] sm:$0xff]  ;;  %v76_v58 = vld [vmem:[%s1290_s2 + $0xf8] sm:$0xff]  ;;  %v698_v59 = vpack.c.bf16 %v71_v54, %v69_v51 }
   0xe   :  { %685 = vmatprep.subr.bf16.mxu0 %v684_v23  ;;  %742 = vmatprep.subr.bf16.mxu1 %v825_v3  ;;  %v74_v57 = vld [vmem:[%s1290_s2 + $0xe8] sm:$0xff]  ;;  %v73_v60 = vld [vmem:[%s1290_s2 + $0xe0] sm:$0xff]  ;;  %v749_v61 = vpack.c.bf16 %v119_v56, %v118_v55  ;;  %v75_v63 = vld [vmem:[%s1290_s2 + $0xf0] sm:$0xff] }
   0xf   :  { %v700_v62 = vpack.c.bf16 %v76_v58, %v74_v57  ;;  %v120_v0 = vld [vmem:[%s1291_s4 + $0x50] sm:$0xff]  ;;  %v121_v1 = vld [vmem:[%s1291_s4 + $0x58] sm:$0xff]  ;;  %v78_v2 = vld [vmem:[%s1290_s2 + $0x108] sm:$0xff]  ;;  %v702_v6 = vpack.c.bf16 %v75_v63, %v73_v60 }
  0x10   :  { %v80_v5 = vld [vmem:[%s1290_s2 + $0x118] sm:$0xff]  ;;  %v77_v7 = vld [vmem:[%s1290_s2 + $0x100] sm:$0xff]  ;;  %v752_v8 = vpack.c.bf16 %v121_v1, %v120_v0  ;;  %v79_v11 = vld [vmem:[%s1290_s2 + $0x110] sm:$0xff] }
  0x11   :  { %687 = vmatpush1.bf16.msra.mxu0 %v686_v32  ;;  %744 = vmatpush3.bf16.msra.mxu1 %v743_v43  ;;  %v1039_v9 = vld [vmem:[%s1292_s1] sm:$0xff]  ;;  %v704_v10 = vpack.c.bf16 %v80_v5, %v78_v2  ;;  %v123_v13 = vld [vmem:[%s1291_s4 + $0x68] sm:$0xff]  ;;  %v84_v15 = vld [vmem:[%s1290_s2 + $0x138] sm:$0xff]  ;;  %v706_v16 = vpack.c.bf16 %v79_v11, %v77_v7 }
  0x12   :  { %689 = vmatprep.subr.bf16.mxu0 %v688_v35  ;;  %745 = vmatprep.subr.bf16.mxu1 %v825_v3  ;;  %v122_v12 = vld [vmem:[%s1291_s4 + $0x60] sm:$0xff]  ;;  %v82_v14 = vld [vmem:[%s1290_s2 + $0x128] sm:$0xff]  ;;  %v83_v20 = vld [vmem:[%s1290_s2 + $0x130] sm:$0xff] }
  0x13   :  { %220 = vmatprep.mubr.f32.mxu0 %v1039_v9  ;;  %v81_v17 = vld [vmem:[%s1290_s2 + $0x120] sm:$0xff]  ;;  %v755_v18 = vpack.c.bf16 %v123_v13, %v122_v12  ;;  %v708_v19 = vpack.c.bf16 %v84_v15, %v82_v14  ;;  %v124_v21 = vld [vmem:[%s1291_s4 + $0x70] sm:$0xff]  ;;  %v125_v22 = vld [vmem:[%s1291_s4 + $0x78] sm:$0xff] }
  0x14   :  { %v86_v23 = vld [vmem:[%s1290_s2 + $0x148] sm:$0xff]  ;;  %v88_v24 = vld [vmem:[%s1290_s2 + $0x158] sm:$0xff]  ;;  %v710_v25 = vpack.c.bf16 %v83_v20, %v81_v17  ;;  %v85_v26 = vld [vmem:[%s1290_s2 + $0x140] sm:$0xff]  ;;  %v758_v27 = vpack.c.bf16 %v125_v22, %v124_v21 }
  0x15   :  { %691 = vmatpush1.bf16.msra.mxu0 %v690_v41  ;;  %747 = vmatpush3.bf16.msra.mxu1 %v746_v52  ;;  %v1083_v28 = vld [vmem:[%s1293_s0] sm:$0xff]  ;;  %v712_v29 = vpack.c.bf16 %v88_v24, %v86_v23  ;;  %v87_v30 = vld [vmem:[%s1290_s2 + $0x150] sm:$0xff]  ;;  %v128_v32 = vld [vmem:[%s1294_s6 + $0x8] sm:$0xff] }
  0x16   :  { %693 = vmatprep.subr.bf16.mxu0 %v692_v44  ;;  %748 = vmatprep.subr.bf16.mxu1 %v825_v3  ;;  %v127_v31 = vld [vmem:[%s1294_s6] sm:$0xff]  ;;  %v90_v33 = vld [vmem:[%s1290_s2 + $0x168] sm:$0xff]  ;;  %v92_v34 = vld [vmem:[%s1290_s2 + $0x178] sm:$0xff]  ;;  %v144_v35 = vmax.f32 %v1083_v28, 0.0  ;;  %v714_v36 = vpack.c.bf16 %v87_v30, %v85_v26 }
  0x17   :  { %v89_v37 = vld [vmem:[%s1290_s2 + $0x160] sm:$0xff]  ;;  %v761_v38 = vpack.c.bf16 %v128_v32, %v127_v31  ;;  %v716_v39 = vpack.c.bf16 %v92_v34, %v90_v33  ;;  %v91_v40 = vld [vmem:[%s1290_s2 + $0x170] sm:$0xff]  ;;  %v130_v42 = vld [vmem:[%s1294_s6 + $0x18] sm:$0xff] }
  0x18   :  { %v129_v41 = vld [vmem:[%s1294_s6 + $0x10] sm:$0xff]  ;;  %v94_v43 = vld [vmem:[%s1290_s2 + $0x188] sm:$0xff]  ;;  %v96_v44 = vld [vmem:[%s1290_s2 + $0x198] sm:$0xff]  ;;  %v718_v45 = vpack.c.bf16 %v91_v40, %v89_v37 }
  0x19   :  { %695 = vmatpush1.bf16.msra.mxu0 %v694_v50  ;;  %750 = vmatpush3.bf16.msra.mxu1 %v749_v61  ;;  %v93_v46 = vld [vmem:[%s1290_s2 + $0x180] sm:$0xff]  ;;  %v764_v47 = vpack.c.bf16 %v130_v42, %v129_v41  ;;  %v720_v48 = vpack.c.bf16 %v96_v44, %v94_v43  ;;  %v95_v49 = vld [vmem:[%s1290_s2 + $0x190] sm:$0xff]  ;;  %v132_v51 = vld [vmem:[%s1294_s6 + $0x28] sm:$0xff] }
  0x1a   :  { %697 = vmatprep.subr.bf16.mxu0 %v696_v53  ;;  %751 = vmatprep.subr.bf16.mxu1 %v825_v3  ;;  %v131_v50 = vld [vmem:[%s1294_s6 + $0x20] sm:$0xff]  ;;  %v98_v52 = vld [vmem:[%s1290_s2 + $0x1a8] sm:$0xff]  ;;  %v100_v53 = vld [vmem:[%s1290_s2 + $0x1b8] sm:$0xff]  ;;  %v722_v54 = vpack.c.bf16 %v95_v49, %v93_v46 }
  0x1b   :  { %v97_v55 = vld [vmem:[%s1290_s2 + $0x1a0] sm:$0xff]  ;;  %v767_v56 = vpack.c.bf16 %v132_v51, %v131_v50  ;;  %v724_v57 = vpack.c.bf16 %v100_v53, %v98_v52  ;;  %v99_v58 = vld [vmem:[%s1290_s2 + $0x1b0] sm:$0xff]  ;;  %v134_v60 = vld [vmem:[%s1294_s6 + $0x38] sm:$0xff]  ;;  %v146_v51 = vlaneseq }
  0x1c   :  { %v102_v61 = vld [vmem:[%s1290_s2 + $0x1c8] sm:$0xff]  ;;  %v726_v63 = vpack.c.bf16 %v99_v58, %v97_v55  ;;  %v101_v0 = vld [vmem:[%s1290_s2 + $0x1c0] sm:$0xff]  ;;  %v103_v5 = vld [vmem:[%s1290_s2 + $0x1d0] sm:$0xff] }
  0x1d   :  { %699 = vmatpush1.bf16.msra.mxu0 %v698_v59  ;;  %753 = vmatpush3.bf16.msra.mxu1 %v752_v8  ;;  %v133_v59 = vld [vmem:[%s1294_s6 + $0x30] sm:$0xff]  ;;  %v136_v7 = vld [vmem:[%s1294_s6 + $0x48] sm:$0xff]  ;;  %v730_v11 = vpack.c.bf16 %v103_v5, %v101_v0  ;;  %v105_v12 = vld [vmem:[%s1290_s2 + $0x1e0] sm:$0xff]  ;;  %v147_v52 = vshrl.u32 %v146_v51, 7 }
  0x1e   :  { %701 = vmatprep.subr.bf16.mxu0 %v700_v62  ;;  %754 = vmatprep.subr.bf16.mxu1 %v825_v3  ;;  %v104_v62 = vld [vmem:[%s1290_s2 + $0x1d8] sm:$0xff]  ;;  %v770_v1 = vpack.c.bf16 %v134_v60, %v133_v59  ;;  %v106_v8 = vld [vmem:[%s1290_s2 + $0x1e8] sm:$0xff]  ;;  %v107_v15 = vld [vmem:[%s1290_s2 + $0x1f0] sm:$0xff] }
  0x1f   :  { %v728_v2 = vpack.c.bf16 %v104_v62, %v102_v61  ;;  %v138_v17 = vld [vmem:[%s1294_s6 + $0x58] sm:$0xff]  ;;  %v139_v20 = vld [vmem:[%s1294_s6 + $0x60] sm:$0xff]  ;;  %v140_v21 = vld [vmem:[%s1294_s6 + $0x68] sm:$0xff]  ;;  %v148_v53 = vsub.s32 0, %v147_v52  ;;  %v152_v55 = vsub.s32 1, %v147_v52 }
  0x20   :  { %v779_v22 = vpack.c.bf16 %v140_v21, %v139_v20  ;;  %v141_v23 = vld [vmem:[%s1294_s6 + $0x70] sm:$0xff]  ;;  %v142_v24 = vld [vmem:[%s1294_s6 + $0x78] sm:$0xff]  ;;  %v399_v26 = vld [vmem:[%s1295_s8] sm:$0xff] }
  0x21   :  { %703 = vmatpush1.bf16.msra.mxu0 %v702_v6  ;;  %756 = vmatpush3.bf16.msra.mxu1 %v755_v18  ;;  %v135_v6 = vld [vmem:[%s1294_s6 + $0x40] sm:$0xff]  ;;  %v734_v18 = vpack.c.bf16 %v107_v15, %v105_v12  ;;  %v404_v32 = vld [vmem:[%s1295_s8 + $0x28] sm:$0xff]  ;;  %v405_v34 = vld [vmem:[%s1295_s8 + $0x30] sm:$0xff] }
  0x22   :  { %705 = vmatprep.subr.bf16.mxu0 %v704_v10  ;;  %757 = vmatprep.subr.bf16.mxu1 %v825_v3  ;;  %v108_v10 = vld [vmem:[%s1290_s2 + $0x1f8] sm:$0xff]  ;;  %v773_v13 = vpack.c.bf16 %v136_v7, %v135_v6  ;;  %v403_v31 = vld [vmem:[%s1295_s8 + $0x20] sm:$0xff]  ;;  %v409_v40 = vld [vmem:[%s1295_s8 + $0x50] sm:$0xff] }
  0x23   :  { %v732_v14 = vpack.c.bf16 %v108_v10, %v106_v8  ;;  %v791_v33 = vpack.c.bf16 %v404_v32, %v403_v31  ;;  %v407_v37 = vld [vmem:[%s1295_s8 + $0x40] sm:$0xff]  ;;  %v410_v41 = vld [vmem:[%s1295_s8 + $0x58] sm:$0xff]  ;;  %v412_v44 = vld [vmem:[%s1295_s8 + $0x68] sm:$0xff] }
  0x24   :  { %v800_v42 = vpack.c.bf16 %v410_v41, %v409_v40  ;;  %v411_v43 = vld [vmem:[%s1295_s8 + $0x60] sm:$0xff]  ;;  %v413_v46 = vld [vmem:[%s1295_s8 + $0x70] sm:$0xff] }
  0x25   :  { %707 = vmatpush1.bf16.msra.mxu0 %v706_v16  ;;  %759 = vmatpush3.bf16.msra.mxu1 %v758_v27  ;;  %v137_v16 = vld [vmem:[%s1294_s6 + $0x50] sm:$0xff]  ;;  %v400_v27 = vld [vmem:[%s1295_s8 + $0x8] sm:$0xff]  ;;  %v514_v6 = vld [vmem:[%s1297_s7] ss:$0 sm:$0xff] }
  0x26   :  { %709 = vmatprep.subr.bf16.mxu0 %v708_v19  ;;  %760 = vmatprep.subr.bf16.mxu1 %v825_v3  ;;  %v776_v19 = vpack.c.bf16 %v138_v17, %v137_v16  ;;  %v785_v28 = vpack.c.bf16 %v400_v27, %v399_v26  ;;  %v513_v10 = vld [vmem:[%s1298_s5] ss:$0 sm:$0xff] }
  0x27   :  { %v515_v21 = vld [vmem:[%s1300_s9] ss:$0 sm:$0xff] }
  0x28   :  { %600 = vmatmul.mubr.f32.vlgmr.msra.gmra.mrb[0].mxu1 %v144_v35 }
  0x29   :  { %711 = vmatpush1.bf16.msra.mxu0 %v710_v25  ;;  %762 = vmatpush3.bf16.msra.mxu1 %v761_v38  ;;  %v782_v25 = vpack.c.bf16 %v142_v24, %v141_v23  ;;  %v408_v38 = vld [vmem:[%s1295_s8 + $0x48] sm:$0xff] }
  0x2a   :  { %713 = vmatprep.subr.bf16.mxu0 %v712_v29  ;;  %763 = vmatprep.subr.bf16.mxu1 %v825_v3  ;;  %v402_v29 = vld [vmem:[%s1295_s8 + $0x18] sm:$0xff] }
  0x2b   :  { %634 = vmatprep.mubr.msk.f32.mxu1 %vm826_vm0, %v827_v4 }
  0x2d   :  { %715 = vmatpush1.bf16.msra.mxu0 %v714_v36  ;;  %765 = vmatpush3.bf16.msra.mxu1 %v764_v47  ;;  %v414_v47 = vld [vmem:[%s1295_s8 + $0x78] sm:$0xff] }
  0x2e   :  { %717 = vmatprep.subr.bf16.mxu0 %v716_v39  ;;  %766 = vmatprep.subr.bf16.mxu1 %v825_v3  ;;  %v797_v39 = vpack.c.bf16 %v408_v38, %v407_v37 }
  0x31   :  { %719 = vmatpush1.bf16.msra.mxu0 %v718_v45  ;;  %768 = vmatpush3.bf16.msra.mxu1 %v767_v56  ;;  %v803_v45 = vpack.c.bf16 %v412_v44, %v411_v43 }
  0x32   :  { %721 = vmatprep.subr.bf16.mxu0 %v720_v48  ;;  %769 = vmatprep.subr.bf16.mxu1 %v825_v3  ;;  %v806_v48 = vpack.c.bf16 %v414_v47, %v413_v46 }
  0x35   :  { %723 = vmatpush1.bf16.msra.mxu0 %v722_v54  ;;  %771 = vmatpush3.bf16.msra.mxu1 %v770_v1  ;;  %v109_v54 = vld [vmem:[%s1296_s3] sm:$0x3] }
  0x36   :  { %725 = vmatprep.subr.bf16.mxu0 %v724_v57  ;;  %772 = vmatprep.subr.bf16.mxu1 %v825_v3  ;;  %v149_v56 = vrot.slane %v109_v54, %v148_v53  ;;  %v153_v58 = vrot.slane %v109_v54, %v152_v55 }
  0x39   :  { %727 = vmatpush1.bf16.msra.mxu0 %v726_v63  ;;  %774 = vmatpush3.bf16.msra.mxu1 %v773_v13 }
  0x3a   :  { %729 = vmatprep.subr.bf16.mxu0 %v728_v2  ;;  %775 = vmatprep.subr.bf16.mxu1 %v825_v3 }
  0x3d   :  { %731 = vmatpush1.bf16.msra.mxu0 %v730_v11  ;;  %777 = vmatpush3.bf16.msra.mxu1 %v776_v19 }
  0x3e   :  { %733 = vmatprep.subr.bf16.mxu0 %v732_v14  ;;  %778 = vmatprep.subr.bf16.mxu1 %v825_v3 }
  0x41   :  { %735 = vmatpush1.bf16.msra.mxu0 %v734_v18  ;;  %780 = vmatpush3.bf16.msra.mxu1 %v779_v22 }
  0x42   :  { %784 = vmatprep.subr.bf16.mxu0 %v825_v3  ;;  %781 = vmatprep.subr.bf16.mxu1 %v825_v3 }
  0x44   :  { %221 = vmatmul.mubr.f32.vlgmr.msra.gmra.mrb[0].mxu0 %v144_v35  ;;  %v406_v35 = vld [vmem:[%s1295_s8 + $0x38] sm:$0xff] }
  0x45   :  { %669 = vmatprep.mubr.msk.f32.mxu0 %vm826_vm0, %v827_v4  ;;  %783 = vmatpush3.bf16.msra.mxu1 %v782_v25  ;;  %v401_v4 = vld [vmem:[%s1295_s8 + $0x10] sm:$0xff]  ;;  %v794_v36 = vpack.c.bf16 %v406_v35, %v405_v34 }
  0x46   :  { %786 = vmatpush3.bf16.msra.mxu0 %v785_v28  ;;  %v788_v30 = vpack.c.bf16 %v402_v29, %v401_v4 }
  0x47   :  { %787 = vmatprep.subr.bf16.mxu0 %v825_v3 }
  0x48   :  { %635 = vmatmul.mubr.f32.vlgmr.msra.gmra.mrb[2].mxu1 %v1039_v9 }
  0x4a   :  { %789 = vmatpush3.bf16.msra.mxu0 %v788_v30 }
  0x4b   :  { %790 = vmatprep.subr.bf16.mxu0 %v825_v3 }
  0x4e   :  { %792 = vmatpush3.bf16.msra.mxu0 %v791_v33 }
  0x4f   :  { %793 = vmatprep.subr.bf16.mxu0 %v825_v3 }
  0x52   :  { %795 = vmatpush3.bf16.msra.mxu0 %v794_v36 }
  0x53   :  { %796 = vmatprep.subr.bf16.mxu0 %v825_v3 }
  0x56   :  { %798 = vmatpush3.bf16.msra.mxu0 %v797_v39 }
  0x57   :  { %799 = vmatprep.subr.bf16.mxu0 %v825_v3 }
  0x5a   :  { %801 = vmatpush3.bf16.msra.mxu0 %v800_v42 }
  0x5b   :  { %802 = vmatprep.subr.bf16.mxu0 %v825_v3 }
  0x5e   :  { %804 = vmatpush3.bf16.msra.mxu0 %v803_v45 }
  0x5f   :  { %805 = vmatprep.subr.bf16.mxu0 %v825_v3 }
  0x62   :  { %807 = vmatpush3.bf16.msra.mxu0 %v806_v48 }
  0xfb   :  { %v311_v49 = vpop.f32.mrb[0].mxu1 }
  0xfc   :  { %v601_v50 = vpop.f32.mrb[1].mxu1  ;;  %v312_v12 = vadd.f32 %v513_v10, %v311_v49 }
 0x117   :  { %v222_v57 = vpop.f32.mrb[0].mxu0 }
 0x118   :  { %v223_v59 = vadd.f32 %v222_v57, %v149_v56  ;;  %v224_v60 = vpop.f32.mrb[1].mxu0 }
 0x119   :  { %v225_v62 = vadd.f32 %v224_v60, %v153_v58 }
 0x11a   :  { %v511_v61 = vmul.f32 -1.442695, %v223_v59 }
 0x11b   :  { %v512_v3 = vmul.f32 -1.442695, %v225_v62  ;;  %v387_v63 = vpop.f32.mrb[2].mxu1 }
 0x11c   :  { %811 = vpow2.f32 %v511_v61  ;;  %v636_v0 = vpop.f32.mrb[3].mxu1  ;;  %v388_v8 = vadd.f32 %v514_v6, %v387_v63 }
 0x11d   :  { %813 = vpow2.f32 %v512_v3 }
 0x126   :  { %v812_v1 = vpop.eup %811 }
 0x127   :  { %v230_v2 = vadd.f32 1.0, %v812_v1  ;;  %v814_v5 = vpop.eup %813 }
 0x128   :  { %v236_v7 = vadd.f32 1.0, %v814_v5 }
 0x129   :  { %815 = vrcp.f32 %v230_v2 }
 0x12a   :  { %817 = vrcp.f32 %v236_v7 }
 0x133   :  { %v816_v11 = vpop.eup %815 }
 0x134   :  { %v391_v13 = vmul.f32 %v816_v11, %v388_v8  ;;  %v818_v15 = vpop.eup %817 }
 0x135   :  { %v394_v16 = vsub.f32 1.0, %v818_v15  ;;  %v396_v19 = vmul.f32 %v818_v15, %v1039_v9 }
 0x136   :  { %v392_v14 = vadd.f32 %v391_v13, %v312_v12 }
 0x138   :  { %819 = vtanh.f32 %v392_v14 }
 0x142   :  { %v820_v17 = vpop.eup %819 }
 0x143   :  { %v395_v18 = vmul.f32 %v820_v17, %v394_v16 }
 0x145   :  { %v397_v20 = vadd.f32 %v396_v19, %v395_v18 }
 0x147   :  { %398 = vst [vmem:[%s1299_s11] sm:$0xff] %v397_v20  ;;  %670 = vmatmul.mubr.f32.vlgmr.msra.gmra.mrb[2].mxu0 %v397_v20 }
 0x21a   :  { %v488_v22 = vpop.f32.mrb[2].mxu0 }
 0x21b   :  { %v489_v23 = vadd.f32 %v515_v21, %v488_v22  ;;  %v671_v24 = vpop.f32.mrb[3].mxu0 }
 0x21d   :  { %492 = vmax.xlane.f32.xlu0 %v489_v23 }
 0x2aa   :  { %v493_v25 = vpop.xlane.xlu0 %492 }
 0x2ab   :  { %v494_v26 = vsub.f32 %v489_v23, %v493_v25 }
 0x2ad   :  { %v495_v27 = vmul.f32 1.442695, %v494_v26 }
 0x2af   :  { %821 = vpow2.f32 %v495_v27 }
 0x2b9   :  { %v822_v28 = vpop.eup %821 }
 0x2ba   :  { %497 = vadd.xlane.f32.xlu0 %v822_v28 }
 0x347   :  { %v498_v9 = vpop.xlane.xlu0 %497 }
 0x348   :  { %823 = vlog2.f32 %v498_v9 }
 0x352   :  { %v824_v4 = vpop.eup %823 }
 0x353   :  { %v500_v29 = vmul.f32 0.6931472, %v824_v4 }
 0x355   :  { %v501_v30 = vsub.f32 %v494_v26, %v500_v29 }
 0x357   :  { %502 = vst [vmem:[%s1301_s10] sm:$0xff] %v501_v30 }

</bundles_post_ra>
